<compile_context>
chip_gen: v6e
topology: v6e:2x2x1
jax: 0.10.0
libtpu: 0.0.40
codegen_flags: <defaults>
</compile_context>

<pallas_src>
import math

import jax
import jax.numpy as jnp
from jax import lax
from jax.experimental import pallas as pl
from jax.experimental.pallas import tpu as pltpu


def _round_up(x, m):
    return (x + m - 1) // m * m


def _make_mtan_kernel(bb, num_heads, d, lq, use_bf16):
    """Kernel specialized for (batch-block bb, heads H, value dim D, Lq rows)."""
    H, D = num_heads, d
    mm_dtype = jnp.bfloat16 if use_bf16 else jnp.float32
    unroll_b = bb <= 2

    def kernel(q_ref, k_ref, v_ref, m_ref, vmean_ref, wout_ref, bout_ref,
               o_ref, nd_acc, m_acc, xh_sc):
        # q_ref:    (bb, H, Lq, Ek)   projected query, 1/sqrt(dk) folded in
        # k_ref:    (bb, H, Ek, tLk)  projected key, Ek-major (no transpose needed)
        # v_ref:    (bb, tLk, D)      raw values (f32)
        # m_ref:    (bb, tLk, D)      {0,1} keep-indicator (bf16)
        # vmean_ref:(bb, 1, D)        per-batch mean over ORIGINAL keys (fallback)
        # wout_ref: (H*D, NHp)        output weight^T, lane-padded
        # bout_ref: (1, NHp)
        # o_ref:    (bb, Lq, NHp)     resident across the Lk-tile axis
        # nd_acc:   (bb*H, Lq, 2D)    running [num | den] accumulator
        # m_acc:    (bb*H, Lq, 1)     running row max
        # xh_sc:    (Lq, H*D)         concatenated head outputs
        j = pl.program_id(1)
        nk = pl.num_programs(1)

        @pl.when(j == 0)
        def _init():
            nd_acc[...] = jnp.zeros_like(nd_acc)
            m_acc[...] = jnp.full_like(m_acc, -jnp.inf)

        def accum_body(b, carry):
            ind = m_ref[b].astype(jnp.float32)                 # (tLk, D)
            v = v_ref[b].astype(jnp.float32)                   # (tLk, D)
            # fused num/den RHS, built once per batch element (shared by heads)
            rhs = jnp.concatenate([ind * v, ind], axis=1).astype(mm_dtype)
            for h in range(H):                                  # static: H small
                idx = b * H + h
                s = jnp.dot(q_ref[b, h].astype(mm_dtype),
                            k_ref[b, h].astype(mm_dtype),
                            preferred_element_type=jnp.float32)   # (Lq, tLk)
                m_prev = m_acc[idx]                               # (Lq, 1)
                m_new = jnp.maximum(m_prev, jnp.max(s, axis=-1, keepdims=True))
                alpha = jnp.exp(m_prev - m_new)                   # (Lq, 1)
                # NOTE: row max is over ALL keys (incl. masked / padded ones);
                # num/den is normalization-invariant so this matches PyTorch
                # unless observed exps underflow (~80+ score gap), in which
                # case den->0 and we fall back to the uniform-mean path.
                e = jnp.exp((s - m_new).astype(mm_dtype))         # (Lq, tLk)
                nd_acc[idx] = alpha * nd_acc[idx] + jnp.dot(
                    e, rhs, preferred_element_type=jnp.float32)   # (Lq, 2D)
                m_acc[idx] = m_new
            return carry

        lax.fori_loop(0, bb, accum_body, 0, unroll=unroll_b)

        @pl.when(j == nk - 1)
        def _finalize():
            wout = wout_ref[...].astype(mm_dtype)               # (H*D, NHp)
            bout = bout_ref[...]                                # (1, NHp)

            def fin_body(b, carry):
                # hoisted out of the head loop (JAX does not CSE broadcasts)
                vmean_b = jnp.broadcast_to(vmean_ref[b], (lq, D))
                for h in range(H):
                    idx = b * H + h
                    nd = nd_acc[idx]
                    num = nd[:, :D]
                    den = nd[:, D:]
                    if use_bf16:
                        inv = pl.reciprocal(jnp.maximum(den, 1e-30), approx=True)
                    else:
                        inv = 1.0 / jnp.maximum(den, 1e-30)
                    # PyTorch degenerate case (a value dim with no observed key)
                    # gives a uniform softmax == plain mean over keys.
                    xh = jnp.where(den > 0.0, num * inv, vmean_b)
                    xh_sc[:, h * D:(h + 1) * D] = xh
                # single fused output projection: (Lq, H*D) @ (H*D, NHp) + bias
                out = jnp.dot(xh_sc[...].astype(mm_dtype), wout,
                              preferred_element_type=jnp.float32) + bout
                o_ref[b] = out.astype(o_ref.dtype)
                return carry

            lax.fori_loop(0, bb, fin_body, 0, unroll=unroll_b)

    return kernel


def _choose_blocking(B, H, Lq_p, Ek, D, NHp, Lk, *, max_batch_block=4,
                     lk_tile_target=512, block_budget_bytes=16 << 20):
    """Pick batch block, Lk tile and a vmem limit from a VMEM block budget."""
    if Lk <= lk_tile_target:
        lk_tile = _round_up(Lk, 128)
        Lk_p = lk_tile
    else:
        lk_tile = lk_tile_target
        Lk_p = _round_up(Lk, lk_tile)

    def est_bytes(bb):
        f32 = 4
        blocks = (bb * H * Lq_p * Ek            # q
                  + bb * H * Ek * lk_tile       # k
                  + bb * lk_tile * D            # value (f32)
                  + bb * lk_tile * D // 2       # mask indicator (bf16)
                  + bb * D                      # vmean
                  + H * D * NHp + NHp           # w_out + b_out
                  + bb * Lq_p * NHp)            # out
        scratch = (bb * H * Lq_p * 2 * D        # num/den accumulator
                   + bb * H * Lq_p * 128        # running max (lane padded)
                   + Lq_p * max(H * D, 128))    # concat-head scratch
        return 2 * blocks * f32 + scratch * f32  # double-buffered pipeline blocks

    divisors = [d for d in range(1, min(B, max_batch_block) + 1)
                if B % d == 0 and est_bytes(d) <= block_budget_bytes]
    if not divisors:
        divisors = [1]
    # prefer >= 2 grid steps so both v7x TensorCores get work
    multi_step = [d for d in divisors if B // d >= 2]
    bb = max(multi_step) if multi_step else max(divisors)

    vmem_limit = int(min(max(est_bytes(bb) * 3 // 2, 16 << 20), 64 << 20))
    return bb, lk_tile, Lk_p, vmem_limit


def mtan_attention_pallas(q, k, v, m_ind, vmean, w_pad, b_pad, *,
                          bb, lk_tile, use_bf16, vmem_limit):
    B, H, Lq_p, Ek = q.shape
    Lk_p, D = v.shape[1], v.shape[2]
    NHp = w_pad.shape[1]
    grid = (B // bb, Lk_p // lk_tile)

    kernel = _make_mtan_kernel(bb, H, D, Lq_p, use_bf16)
    return pl.pallas_call(
        kernel,
        out_shape=jax.ShapeDtypeStruct((B, Lq_p, NHp), jnp.float32),
        grid=grid,
        in_specs=[
            pl.BlockSpec((bb, H, Lq_p, Ek), lambda i, j: (i, 0, 0, 0)),
            pl.BlockSpec((bb, H, Ek, lk_tile), lambda i, j: (i, 0, 0, j)),
            pl.BlockSpec((bb, lk_tile, D), lambda i, j: (i, j, 0)),
            pl.BlockSpec((bb, lk_tile, D), lambda i, j: (i, j, 0)),
            pl.BlockSpec((bb, 1, D), lambda i, j: (i, 0, 0)),
            pl.BlockSpec((H * D, NHp), lambda i, j: (0, 0)),
            pl.BlockSpec((1, NHp), lambda i, j: (0, 0)),
        ],
        out_specs=pl.BlockSpec((bb, Lq_p, NHp), lambda i, j: (i, 0, 0)),
        scratch_shapes=[
            pltpu.VMEM((bb * H, Lq_p, 2 * D), jnp.float32),   # running [num|den]
            pltpu.VMEM((bb * H, Lq_p, 1), jnp.float32),       # running row max
            pltpu.VMEM((Lq_p, H * D), jnp.float32),           # concat head outputs
        ],
        compiler_params=pltpu.CompilerParams(
            dimension_semantics=("parallel", "arbitrary"),
            vmem_limit_bytes=vmem_limit,
        ),
    )(q, k, v, m_ind, vmean, w_pad, b_pad)


def init_params(key, input_dim, nhidden, embed_time, num_heads):
    assert embed_time % num_heads == 0
    ks = jax.random.split(key, 6)

    # PyTorch nn.Linear: weight (out, in), y = x W^T + b
    def lin(kw, kb, fan_in, fan_out):
        bound = 1.0 / math.sqrt(fan_in)
        w = jax.random.uniform(kw, (fan_out, fan_in), jnp.float32, -bound, bound)
        b = jax.random.uniform(kb, (fan_out,), jnp.float32, -bound, bound)
        return w, b

    w_q, b_q = lin(ks[0], ks[1], embed_time, embed_time)
    w_k, b_k = lin(ks[2], ks[3], embed_time, embed_time)
    w_o, b_o = lin(ks[4], ks[5], input_dim * num_heads, nhidden)
    return dict(w_q=w_q, b_q=b_q, w_k=w_k, b_k=b_k, w_out=w_o, b_out=b_o,
                num_heads=num_heads, embed_time=embed_time)


def multi_time_attention_forward(params, query, key, value, mask=None, *,
                                 use_bf16=False):
    """Pallas-backed equivalent of multiTimeAttention.forward (dropout=None)."""
    B, Lk, D = value.shape
    Lq = query.shape[1]
    E = params["embed_time"]
    H = params["num_heads"]
    Ek = E // H
    NH = params["w_out"].shape[0]
    if mask is None:
        mask = jnp.ones_like(value)

    # time-embedding linears + head split (glue, plain JAX); fold 1/sqrt(d_k)
    # into the query projection for free.
    scale = 1.0 / math.sqrt(Ek)
    q = query @ (params["w_q"].T * scale) + params["b_q"] * scale       # (B,Lq,E)
    k = key @ params["w_k"].T + params["b_k"]                           # (B,Lk,E)
    q = q.reshape(B, Lq, H, Ek).transpose(0, 2, 1, 3)                   # (B,H,Lq,Ek)
    k = k.reshape(B, Lk, H, Ek).transpose(0, 2, 3, 1)                   # (B,H,Ek,Lk)

    NHp = _round_up(NH, 128)          # lane-dense output, sliced back afterwards
    Lq_p = _round_up(Lq, 8)
    bb, lk_tile, Lk_p, vmem_limit = _choose_blocking(B, H, Lq_p, Ek, D, NHp, Lk)

    # Zero-padded keys/values/mask are safe: indicator is 0 there, so they add
    # nothing to num/den; padded query rows are sliced off below.
    q = jnp.pad(q, ((0, 0), (0, 0), (0, Lq_p - Lq), (0, 0)))
    k = jnp.pad(k, ((0, 0), (0, 0), (0, 0), (0, Lk_p - Lk)))
    v_pad = jnp.pad(value.astype(jnp.float32), ((0, 0), (0, Lk_p - Lk), (0, 0)))
    ind = (mask != 0).astype(jnp.bfloat16)                              # {0,1}
    ind = jnp.pad(ind, ((0, 0), (0, Lk_p - Lk), (0, 0)))
    # fallback for fully-unobserved value dims == plain mean over ORIGINAL keys
    vmean = jnp.mean(value.astype(jnp.float32), axis=1, keepdims=True)  # (B,1,D)

    w_out_t = params["w_out"].T.astype(jnp.float32)                     # (H*D, NH)
    w_pad = jnp.pad(w_out_t, ((0, 0), (0, NHp - NH)))
    b_pad = jnp.pad(params["b_out"].astype(jnp.float32),
                    (0, NHp - NH)).reshape(1, NHp)

    if use_bf16:
        q = q.astype(jnp.bfloat16)
        k = k.astype(jnp.bfloat16)
        w_pad = w_pad.astype(jnp.bfloat16)

    out = mtan_attention_pallas(q, k, v_pad, ind, vmean, w_pad, b_pad,
                                bb=bb, lk_tile=lk_tile, use_bf16=use_bf16,
                                vmem_limit=vmem_limit)
    return out[:, :Lq, :NH]


def reference_forward(params, query, key, value, mask):
    """Pure-JAX reference mirroring the PyTorch code exactly."""
    B, Lk, D = value.shape
    Lq = query.shape[1]
    E = params["embed_time"]
    H = params["num_heads"]
    Ek = E // H
    q = (query @ params["w_q"].T + params["b_q"]).reshape(B, Lq, H, Ek).transpose(0, 2, 1, 3)
    k = (key @ params["w_k"].T + params["b_k"]).reshape(B, Lk, H, Ek).transpose(0, 2, 1, 3)
    scores = jnp.einsum("bhqe,bhke->bhqk", q, k) / math.sqrt(Ek)        # (B,H,Lq,Lk)
    scores = jnp.broadcast_to(scores[..., None], (B, H, Lq, Lk, D))
    scores = jnp.where(mask[:, None, None, :, :] == 0, -1e9, scores)
    p = jax.nn.softmax(scores, axis=-2)
    x = jnp.sum(p * value[:, None, None, :, :], axis=-2)                # (B,H,Lq,D)
    x = x.transpose(0, 2, 1, 3).reshape(B, Lq, H * D)
    return x @ params["w_out"].T + params["b_out"]


if __name__ == "__main__":
    # small shapes consistent with the module
    B, Lq, Lk = 2, 8, 8
    input_dim, nhidden, embed_time, num_heads = 8, 16, 16, 2

    root = jax.random.PRNGKey(0)
    k_par, k_q, k_k, k_v, k_m = jax.random.split(root, 5)
    params = init_params(k_par, input_dim, nhidden, embed_time, num_heads)

    query = jax.random.normal(k_q, (B, Lq, embed_time), jnp.float32)
    key = jax.random.normal(k_k, (B, Lk, embed_time), jnp.float32)
    value = jax.random.normal(k_v, (B, Lk, input_dim), jnp.float32)
    mask = (jax.random.uniform(k_m, (B, Lk, input_dim)) > 0.3).astype(jnp.float32)
    # exercise the fully-unobserved-feature (degenerate softmax) path too
    mask = mask.at[0, :, 0].set(0.0)

    ref = reference_forward(params, query, key, value, mask)

    # full-precision path (default): must match the f32 reference tightly
    out = multi_time_attention_forward(params, query, key, value, mask)
    out = jax.block_until_ready(out)
    assert out.shape == (B, Lq, nhidden)
    assert jnp.allclose(out, ref, atol=1e-4, rtol=1e-4), "mismatch vs reference"

    # reduced-precision path (bf16 MXU / bf16 exp / approx reciprocal): loose check
    out_bf16 = multi_time_attention_forward(params, query, key, value, mask,
                                            use_bf16=True)
    out_bf16 = jax.block_until_ready(out_bf16)
    assert out_bf16.shape == (B, Lq, nhidden)
    assert float(jnp.max(jnp.abs(out_bf16 - ref))) < 0.5, "bf16 path diverged"

    print("KERNEL_OK")
</pallas_src>

<mosaic_0001>
module attributes {stable_mosaic.version = 11 : i64} {
  func.func @kernel(%arg0: i32, %arg1: i32, %arg2: memref<1x2x8x8xf32, #tpu.memory_space<vmem>>, %arg3: memref<1x2x8x128xf32, #tpu.memory_space<vmem>>, %arg4: memref<1x128x8xf32, #tpu.memory_space<vmem>>, %arg5: memref<1x128x8xbf16, #tpu.memory_space<vmem>>, %arg6: memref<1x1x8xf32, #tpu.memory_space<vmem>>, %arg7: memref<16x128xf32, #tpu.memory_space<vmem>>, %arg8: memref<1x128xf32, #tpu.memory_space<vmem>>, %arg9: memref<1x8x128xf32, #tpu.memory_space<vmem>>, %arg10: memref<2x8x16xf32, #tpu.memory_space<vmem>>, %arg11: memref<2x8x1xf32, #tpu.memory_space<vmem>>, %arg12: memref<8x16xf32, #tpu.memory_space<vmem>>) attributes {dimension_semantics = [#tpu.dimension_semantics<parallel>, #tpu.dimension_semantics<arbitrary>], iteration_bounds = array<i64: 2, 1>, scalar_prefetch = 0 : i64, scratch_operands = 3 : i64, tpu.core_type = #tpu.core_type<tc>, window_params = [{transform_indices = @transform_0, window_bounds = array<i64: 1, 2, 8, 8>}, {transform_indices = @transform_1, window_bounds = array<i64: 1, 2, 8, 128>}, {transform_indices = @transform_2, window_bounds = array<i64: 1, 128, 8>}, {transform_indices = @transform_3, window_bounds = array<i64: 1, 128, 8>}, {transform_indices = @transform_4, window_bounds = array<i64: 1, 1, 8>}, {pipeline_mode = #tpu.pipeline_mode<synchronous>, transform_indices = @transform_5, window_bounds = array<i64: 16, 128>}, {pipeline_mode = #tpu.pipeline_mode<synchronous>, transform_indices = @transform_6, window_bounds = array<i64: 1, 128>}, {transform_indices = @transform_7, window_bounds = array<i64: 1, 8, 128>}]} {
    %c0_i32 = arith.constant 0 : i32
    %0 = arith.cmpi eq, %arg1, %c0_i32 : i32
    %1 = arith.extui %0 : i1 to i32
    %c0_i32_0 = arith.constant 0 : i32
    %2 = arith.cmpi ne, %1, %c0_i32_0 : i32
    scf.if %2 {
      %cst_42 = arith.constant 0.000000e+00 : f32
      %85 = vector.broadcast %cst_42 : f32 to vector<2x8x16xf32>
      %c0_43 = arith.constant 0 : index
      %c0_44 = arith.constant 0 : index
      %c0_45 = arith.constant 0 : index
      %86 = vector.load %arg10[%c0_43, %c0_44, %c0_45] : memref<2x8x16xf32, #tpu.memory_space<vmem>>, vector<2x8x16xf32>
      tpu.vector_store %arg10[%c0_43, %c0_44, %c0_45], %85 {strides = array<i32>} : memref<2x8x16xf32, #tpu.memory_space<vmem>>, vector<2x8x16xf32>,
      %cst_46 = arith.constant 0xFF800000 : f32
      %87 = vector.broadcast %cst_46 : f32 to vector<2x8x1xf32>
      %c0_47 = arith.constant 0 : index
      %c0_48 = arith.constant 0 : index
      %c0_49 = arith.constant 0 : index
      %88 = vector.load %arg11[%c0_47, %c0_48, %c0_49] : memref<2x8x1xf32, #tpu.memory_space<vmem>>, vector<2x8x1xf32>
      tpu.vector_store %arg11[%c0_47, %c0_48, %c0_49], %87 {strides = array<i32>} : memref<2x8x1xf32, #tpu.memory_space<vmem>>, vector<2x8x1xf32>,
    } else {
    }
    %c0_i32_1 = arith.constant 0 : i32
    %3 = arith.index_cast %c0_i32_1 : i32 to index
    %c0 = arith.constant 0 : index
    %c0_2 = arith.constant 0 : index
    %4 = vector.load %arg5[%3, %c0, %c0_2] : memref<1x128x8xbf16, #tpu.memory_space<vmem>>, vector<1x128x8xbf16>
    %5 = vector.shape_cast %4 : vector<1x128x8xbf16> to vector<128x8xbf16>
    %6 = arith.extf %5 : vector<128x8xbf16> to vector<128x8xf32>
    %7 = arith.index_cast %c0_i32_1 : i32 to index
    %c0_3 = arith.constant 0 : index
    %c0_4 = arith.constant 0 : index
    %8 = vector.load %arg4[%7, %c0_3, %c0_4] : memref<1x128x8xf32, #tpu.memory_space<vmem>>, vector<1x128x8xf32>
    %9 = vector.shape_cast %8 : vector<1x128x8xf32> to vector<128x8xf32>
    %10 = arith.mulf %6, %9 : vector<128x8xf32>
    %11 = tpu.concatenate %10, %6 in 1 : vector<128x8xf32>, vector<128x8xf32> -> vector<128x16xf32>
    %c2_i32 = arith.constant 2 : i32
    %12 = arith.muli %c0_i32_1, %c2_i32 : i32
    %c0_i32_5 = arith.constant 0 : i32
    %13 = arith.addi %12, %c0_i32_5 : i32
    %14 = arith.index_cast %c0_i32_1 : i32 to index
    %c0_6 = arith.constant 0 : index
    %c0_7 = arith.constant 0 : index
    %c0_8 = arith.constant 0 : index
    %15 = vector.load %arg2[%14, %c0_6, %c0_7, %c0_8] : memref<1x2x8x8xf32, #tpu.memory_space<vmem>>, vector<1x1x8x8xf32>
    %16 = vector.shape_cast %15 : vector<1x1x8x8xf32> to vector<8x8xf32>
    %17 = arith.index_cast %c0_i32_1 : i32 to index
    %c0_9 = arith.constant 0 : index
    %c0_10 = arith.constant 0 : index
    %c0_11 = arith.constant 0 : index
    %18 = vector.load %arg3[%17, %c0_9, %c0_10, %c0_11] : memref<1x2x8x128xf32, #tpu.memory_space<vmem>>, vector<1x1x8x128xf32>
    %19 = vector.shape_cast %18 : vector<1x1x8x128xf32> to vector<8x128xf32>
    %cst = arith.constant dense<0.000000e+00> : vector<8x128xf32>
    %20 = tpu.matmul %16, %19, %cst {dimension_numbers = #tpu.dot_dimension_numbers<[1], [0], [0], [1], [0, 0, 1, 1], [], []>} : vector<8x8xf32>, vector<8x128xf32>, vector<8x128xf32> -> vector<8x128xf32>
    %21 = arith.index_cast %13 : i32 to index
    %c0_12 = arith.constant 0 : index
    %c0_13 = arith.constant 0 : index
    %22 = vector.load %arg11[%21, %c0_12, %c0_13] : memref<2x8x1xf32, #tpu.memory_space<vmem>>, vector<1x8x1xf32>
    %23 = vector.shape_cast %22 : vector<1x8x1xf32> to vector<8x1xf32>
    %cst_14 = arith.constant dense<0xFF800000> : vector<8xf32>
    %24 = vector.multi_reduction <maximumf>, %20, %cst_14 [1] : vector<8x128xf32> to vector<8xf32>
    %25 = vector.shape_cast %24 : vector<8xf32> to vector<8x1xf32>
    %26 = arith.maximumf %23, %25 : vector<8x1xf32>
    %27 = arith.subf %23, %26 : vector<8x1xf32>
    %28 = math.exp %27 : vector<8x1xf32>
    %29 = vector.broadcast %26 : vector<8x1xf32> to vector<8x128xf32>
    %30 = arith.subf %20, %29 : vector<8x128xf32>
    %31 = math.exp %30 : vector<8x128xf32>
    %32 = arith.index_cast %13 : i32 to index
    %c0_15 = arith.constant 0 : index
    %c0_16 = arith.constant 0 : index
    %33 = vector.load %arg10[%32, %c0_15, %c0_16] : memref<2x8x16xf32, #tpu.memory_space<vmem>>, vector<1x8x16xf32>
    %34 = vector.shape_cast %33 : vector<1x8x16xf32> to vector<8x16xf32>
    %35 = vector.broadcast %28 : vector<8x1xf32> to vector<8x16xf32>
    %36 = arith.mulf %35, %34 : vector<8x16xf32>
    %cst_17 = arith.constant dense<0.000000e+00> : vector<8x16xf32>
    %37 = tpu.matmul %31, %11, %cst_17 {dimension_numbers = #tpu.dot_dimension_numbers<[1], [0], [0], [1], [0, 0, 1, 1], [], []>} : vector<8x128xf32>, vector<128x16xf32>, vector<8x16xf32> -> vector<8x16xf32>
    %38 = arith.addf %36, %37 : vector<8x16xf32>
    %39 = arith.index_cast %13 : i32 to index
    %c0_18 = arith.constant 0 : index
    %c0_19 = arith.constant 0 : index
    %40 = vector.load %arg10[%39, %c0_18, %c0_19] : memref<2x8x16xf32, #tpu.memory_space<vmem>>, vector<1x8x16xf32>
    %41 = vector.shape_cast %40 : vector<1x8x16xf32> to vector<8x16xf32>
    %42 = vector.shape_cast %38 : vector<8x16xf32> to vector<1x8x16xf32>
    tpu.vector_store %arg10[%39, %c0_18, %c0_19], %42 {strides = array<i32>} : memref<2x8x16xf32, #tpu.memory_space<vmem>>, vector<1x8x16xf32>,
    %43 = arith.index_cast %13 : i32 to index
    %c0_20 = arith.constant 0 : index
    %c0_21 = arith.constant 0 : index
    %44 = vector.load %arg11[%43, %c0_20, %c0_21] : memref<2x8x1xf32, #tpu.memory_space<vmem>>, vector<1x8x1xf32>
    %45 = vector.shape_cast %44 : vector<1x8x1xf32> to vector<8x1xf32>
    %46 = vector.shape_cast %26 : vector<8x1xf32> to vector<1x8x1xf32>
    tpu.vector_store %arg11[%43, %c0_20, %c0_21], %46 {strides = array<i32>} : memref<2x8x1xf32, #tpu.memory_space<vmem>>, vector<1x8x1xf32>,
    %c2_i32_22 = arith.constant 2 : i32
    %47 = arith.muli %c0_i32_1, %c2_i32_22 : i32
    %c1_i32 = arith.constant 1 : i32
    %48 = arith.addi %47, %c1_i32 : i32
    %49 = arith.index_cast %c0_i32_1 : i32 to index
    %c1 = arith.constant 1 : index
    %c0_23 = arith.constant 0 : index
    %c0_24 = arith.constant 0 : index
    %50 = vector.load %arg2[%49, %c1, %c0_23, %c0_24] : memref<1x2x8x8xf32, #tpu.memory_space<vmem>>, vector<1x1x8x8xf32>
    %51 = vector.shape_cast %50 : vector<1x1x8x8xf32> to vector<8x8xf32>
    %52 = arith.index_cast %c0_i32_1 : i32 to index
    %c1_25 = arith.constant 1 : index
    %c0_26 = arith.constant 0 : index
    %c0_27 = arith.constant 0 : index
    %53 = vector.load %arg3[%52, %c1_25, %c0_26, %c0_27] : memref<1x2x8x128xf32, #tpu.memory_space<vmem>>, vector<1x1x8x128xf32>
    %54 = vector.shape_cast %53 : vector<1x1x8x128xf32> to vector<8x128xf32>
    %cst_28 = arith.constant dense<0.000000e+00> : vector<8x128xf32>
    %55 = tpu.matmul %51, %54, %cst_28 {dimension_numbers = #tpu.dot_dimension_numbers<[1], [0], [0], [1], [0, 0, 1, 1], [], []>} : vector<8x8xf32>, vector<8x128xf32>, vector<8x128xf32> -> vector<8x128xf32>
    %56 = arith.index_cast %48 : i32 to index
    %c0_29 = arith.constant 0 : index
    %c0_30 = arith.constant 0 : index
    %57 = vector.load %arg11[%56, %c0_29, %c0_30] : memref<2x8x1xf32, #tpu.memory_space<vmem>>, vector<1x8x1xf32>
    %58 = vector.shape_cast %57 : vector<1x8x1xf32> to vector<8x1xf32>
    %cst_31 = arith.constant dense<0xFF800000> : vector<8xf32>
    %59 = vector.multi_reduction <maximumf>, %55, %cst_31 [1] : vector<8x128xf32> to vector<8xf32>
    %60 = vector.shape_cast %59 : vector<8xf32> to vector<8x1xf32>
    %61 = arith.maximumf %58, %60 : vector<8x1xf32>
    %62 = arith.subf %58, %61 : vector<8x1xf32>
    %63 = math.exp %62 : vector<8x1xf32>
    %64 = vector.broadcast %61 : vector<8x1xf32> to vector<8x128xf32>
    %65 = arith.subf %55, %64 : vector<8x128xf32>
    %66 = math.exp %65 : vector<8x128xf32>
    %67 = arith.index_cast %48 : i32 to index
    %c0_32 = arith.constant 0 : index
    %c0_33 = arith.constant 0 : index
    %68 = vector.load %arg10[%67, %c0_32, %c0_33] : memref<2x8x16xf32, #tpu.memory_space<vmem>>, vector<1x8x16xf32>
    %69 = vector.shape_cast %68 : vector<1x8x16xf32> to vector<8x16xf32>
    %70 = vector.broadcast %63 : vector<8x1xf32> to vector<8x16xf32>
    %71 = arith.mulf %70, %69 : vector<8x16xf32>
    %cst_34 = arith.constant dense<0.000000e+00> : vector<8x16xf32>
    %72 = tpu.matmul %66, %11, %cst_34 {dimension_numbers = #tpu.dot_dimension_numbers<[1], [0], [0], [1], [0, 0, 1, 1], [], []>} : vector<8x128xf32>, vector<128x16xf32>, vector<8x16xf32> -> vector<8x16xf32>
    %73 = arith.addf %71, %72 : vector<8x16xf32>
    %74 = arith.index_cast %48 : i32 to index
    %c0_35 = arith.constant 0 : index
    %c0_36 = arith.constant 0 : index
    %75 = vector.load %arg10[%74, %c0_35, %c0_36] : memref<2x8x16xf32, #tpu.memory_space<vmem>>, vector<1x8x16xf32>
    %76 = vector.shape_cast %75 : vector<1x8x16xf32> to vector<8x16xf32>
    %77 = vector.shape_cast %73 : vector<8x16xf32> to vector<1x8x16xf32>
    tpu.vector_store %arg10[%74, %c0_35, %c0_36], %77 {strides = array<i32>} : memref<2x8x16xf32, #tpu.memory_space<vmem>>, vector<1x8x16xf32>,
    %78 = arith.index_cast %48 : i32 to index
    %c0_37 = arith.constant 0 : index
    %c0_38 = arith.constant 0 : index
    %79 = vector.load %arg11[%78, %c0_37, %c0_38] : memref<2x8x1xf32, #tpu.memory_space<vmem>>, vector<1x8x1xf32>
    %80 = vector.shape_cast %79 : vector<1x8x1xf32> to vector<8x1xf32>
    %81 = vector.shape_cast %61 : vector<8x1xf32> to vector<1x8x1xf32>
    tpu.vector_store %arg11[%78, %c0_37, %c0_38], %81 {strides = array<i32>} : memref<2x8x1xf32, #tpu.memory_space<vmem>>, vector<1x8x1xf32>,
    %c1_i32_39 = arith.constant 1 : i32
    %c0_i32_40 = arith.constant 0 : i32
    %82 = arith.cmpi eq, %arg1, %c0_i32_40 : i32
    %83 = arith.extui %82 : i1 to i32
    %c0_i32_41 = arith.constant 0 : i32
    %84 = arith.cmpi ne, %83, %c0_i32_41 : i32
    scf.if %84 {
      %c0_42 = arith.constant 0 : index
      %c0_43 = arith.constant 0 : index
      %85 = vector.load %arg7[%c0_42, %c0_43] : memref<16x128xf32, #tpu.memory_space<vmem>>, vector<16x128xf32>
      %c0_44 = arith.constant 0 : index
      %c0_45 = arith.constant 0 : index
      %86 = vector.load %arg8[%c0_44, %c0_45] : memref<1x128xf32, #tpu.memory_space<vmem>>, vector<1x128xf32>
      %c0_i32_46 = arith.constant 0 : i32
      %87 = arith.index_cast %c0_i32_46 : i32 to index
      %c0_47 = arith.constant 0 : index
      %c0_48 = arith.constant 0 : index
      %88 = vector.load %arg6[%87, %c0_47, %c0_48] : memref<1x1x8xf32, #tpu.memory_space<vmem>>, vector<1x1x8xf32>
      %89 = vector.shape_cast %88 : vector<1x1x8xf32> to vector<1x8xf32>
      %90 = vector.shape_cast %89 : vector<1x8xf32> to vector<1x8xf32>
      %91 = vector.broadcast %90 : vector<1x8xf32> to vector<8x8xf32>
      %c2_i32_49 = arith.constant 2 : i32
      %92 = arith.muli %c0_i32_46, %c2_i32_49 : i32
      %c0_i32_50 = arith.constant 0 : i32
      %93 = arith.addi %92, %c0_i32_50 : i32
      %94 = arith.index_cast %93 : i32 to index
      %c0_51 = arith.constant 0 : index
      %c0_52 = arith.constant 0 : index
      %95 = vector.load %arg10[%94, %c0_51, %c0_52] : memref<2x8x16xf32, #tpu.memory_space<vmem>>, vector<1x8x16xf32>
      %96 = vector.shape_cast %95 : vector<1x8x16xf32> to vector<8x16xf32>
      %97 = vector.extract_strided_slice %96 {offsets = [0, 0], sizes = [8, 8], strides = [1, 1]} : vector<8x16xf32> to vector<8x8xf32>
      %98 = vector.extract_strided_slice %96 {offsets = [0, 8], sizes = [8, 8], strides = [1, 1]} : vector<8x16xf32> to vector<8x8xf32>
      %cst_53 = arith.constant 1.000000e-30 : f32
      %99 = vector.broadcast %cst_53 : f32 to vector<8x8xf32>
      %100 = arith.maximumf %98, %99 : vector<8x8xf32>
      %cst_54 = arith.constant 1.000000e+00 : f32
      %101 = vector.broadcast %cst_54 : f32 to vector<8x8xf32>
      %102 = arith.divf %101, %100 : vector<8x8xf32>
      %cst_55 = arith.constant 0.000000e+00 : f32
      %103 = vector.broadcast %cst_55 : f32 to vector<8x8xf32>
      %104 = arith.cmpf ogt, %98, %103 : vector<8x8xf32>
      %105 = arith.mulf %97, %102 : vector<8x8xf32>
      %106 = arith.select %104, %105, %91 : vector<8x8xi1>, vector<8x8xf32>
      %c0_56 = arith.constant 0 : index
      %c0_57 = arith.constant 0 : index
      %107 = vector.load %arg12[%c0_56, %c0_57] : memref<8x16xf32, #tpu.memory_space<vmem>>, vector<8x8xf32>
      tpu.vector_store %arg12[%c0_56, %c0_57], %106 {strides = array<i32>} : memref<8x16xf32, #tpu.memory_space<vmem>>, vector<8x8xf32>,
      %c2_i32_58 = arith.constant 2 : i32
      %108 = arith.muli %c0_i32_46, %c2_i32_58 : i32
      %c1_i32_59 = arith.constant 1 : i32
      %109 = arith.addi %108, %c1_i32_59 : i32
      %110 = arith.index_cast %109 : i32 to index
      %c0_60 = arith.constant 0 : index
      %c0_61 = arith.constant 0 : index
      %111 = vector.load %arg10[%110, %c0_60, %c0_61] : memref<2x8x16xf32, #tpu.memory_space<vmem>>, vector<1x8x16xf32>
      %112 = vector.shape_cast %111 : vector<1x8x16xf32> to vector<8x16xf32>
      %113 = vector.extract_strided_slice %112 {offsets = [0, 0], sizes = [8, 8], strides = [1, 1]} : vector<8x16xf32> to vector<8x8xf32>
      %114 = vector.extract_strided_slice %112 {offsets = [0, 8], sizes = [8, 8], strides = [1, 1]} : vector<8x16xf32> to vector<8x8xf32>
      %cst_62 = arith.constant 1.000000e-30 : f32
      %115 = vector.broadcast %cst_62 : f32 to vector<8x8xf32>
      %116 = arith.maximumf %114, %115 : vector<8x8xf32>
      %cst_63 = arith.constant 1.000000e+00 : f32
      %117 = vector.broadcast %cst_63 : f32 to vector<8x8xf32>
      %118 = arith.divf %117, %116 : vector<8x8xf32>
      %cst_64 = arith.constant 0.000000e+00 : f32
      %119 = vector.broadcast %cst_64 : f32 to vector<8x8xf32>
      %120 = arith.cmpf ogt, %114, %119 : vector<8x8xf32>
      %121 = arith.mulf %113, %118 : vector<8x8xf32>
      %122 = arith.select %120, %121, %91 : vector<8x8xi1>, vector<8x8xf32>
      %c0_65 = arith.constant 0 : index
      %c8 = arith.constant 8 : index
      %123 = vector.load %arg12[%c0_65, %c8] : memref<8x16xf32, #tpu.memory_space<vmem>>, vector<8x8xf32>
      tpu.vector_store %arg12[%c0_65, %c8], %122 {strides = array<i32>} : memref<8x16xf32, #tpu.memory_space<vmem>>, vector<8x8xf32>,
      %c0_66 = arith.constant 0 : index
      %c0_67 = arith.constant 0 : index
      %124 = vector.load %arg12[%c0_66, %c0_67] : memref<8x16xf32, #tpu.memory_space<vmem>>, vector<8x16xf32>
      %cst_68 = arith.constant dense<0.000000e+00> : vector<8x128xf32>
      %125 = tpu.matmul %124, %85, %cst_68 {dimension_numbers = #tpu.dot_dimension_numbers<[1], [0], [0], [1], [0, 0, 1, 1], [], []>} : vector<8x16xf32>, vector<16x128xf32>, vector<8x128xf32> -> vector<8x128xf32>
      %126 = vector.broadcast %86 : vector<1x128xf32> to vector<8x128xf32>
      %127 = arith.addf %125, %126 : vector<8x128xf32>
      %128 = arith.index_cast %c0_i32_46 : i32 to index
      %c0_69 = arith.constant 0 : index
      %c0_70 = arith.constant 0 : index
      %129 = vector.load %arg9[%128, %c0_69, %c0_70] : memref<1x8x128xf32, #tpu.memory_space<vmem>>, vector<1x8x128xf32>
      %130 = vector.shape_cast %129 : vector<1x8x128xf32> to vector<8x128xf32>
      %131 = vector.shape_cast %127 : vector<8x128xf32> to vector<1x8x128xf32>
      tpu.vector_store %arg9[%128, %c0_69, %c0_70], %131 {strides = array<i32>} : memref<1x8x128xf32, #tpu.memory_space<vmem>>, vector<1x8x128xf32>,
      %c1_i32_71 = arith.constant 1 : i32
    } else {
    }
    return
  }
  func.func @transform_0(%arg0: i32, %arg1: i32) -> (i32, i32, i32, i32) {
    %c0_i32 = arith.constant 0 : i32
    %c0_i32_0 = arith.constant 0 : i32
    %c0_i32_1 = arith.constant 0 : i32
    %c0_i32_2 = arith.constant 0 : i32
    return %arg0, %c0_i32, %c0_i32_0, %c0_i32_1 : i32, i32, i32, i32
  }
  func.func @transform_1(%arg0: i32, %arg1: i32) -> (i32, i32, i32, i32) {
    %c0_i32 = arith.constant 0 : i32
    %c0_i32_0 = arith.constant 0 : i32
    %c0_i32_1 = arith.constant 0 : i32
    return %arg0, %c0_i32, %c0_i32_0, %arg1 : i32, i32, i32, i32
  }
  func.func @transform_2(%arg0: i32, %arg1: i32) -> (i32, i32, i32) {
    %c0_i32 = arith.constant 0 : i32
    %c0_i32_0 = arith.constant 0 : i32
    return %arg0, %arg1, %c0_i32 : i32, i32, i32
  }
  func.func @transform_3(%arg0: i32, %arg1: i32) -> (i32, i32, i32) {
    %c0_i32 = arith.constant 0 : i32
    %c0_i32_0 = arith.constant 0 : i32
    return %arg0, %arg1, %c0_i32 : i32, i32, i32
  }
  func.func @transform_4(%arg0: i32, %arg1: i32) -> (i32, i32, i32) {
    %c0_i32 = arith.constant 0 : i32
    %c0_i32_0 = arith.constant 0 : i32
    %c0_i32_1 = arith.constant 0 : i32
    return %arg0, %c0_i32, %c0_i32_0 : i32, i32, i32
  }
  func.func @transform_5(%arg0: i32, %arg1: i32) -> (i32, i32) {
    %c0_i32 = arith.constant 0 : i32
    %c0_i32_0 = arith.constant 0 : i32
    %c0_i32_1 = arith.constant 0 : i32
    return %c0_i32, %c0_i32_0 : i32, i32
  }
  func.func @transform_6(%arg0: i32, %arg1: i32) -> (i32, i32) {
    %c0_i32 = arith.constant 0 : i32
    %c0_i32_0 = arith.constant 0 : i32
    %c0_i32_1 = arith.constant 0 : i32
    return %c0_i32, %c0_i32_0 : i32, i32
  }
  func.func @transform_7(%arg0: i32, %arg1: i32) -> (i32, i32, i32) {
    %c0_i32 = arith.constant 0 : i32
    %c0_i32_0 = arith.constant 0 : i32
    %c0_i32_1 = arith.constant 0 : i32
    return %arg0, %c0_i32, %c0_i32_0 : i32, i32, i32
  }
}

</mosaic_0001>

<bundles_post_ra>
// kernel: tpu_custom_call.1
= control target key start
LH: loop header
LB: loop body
LE: loop exit
PB: predicated region body
PF: predicated region fallthrough
CT: control target
= control target key end

     0   :  { %12 = vsyncpa [#allocation6], 0  ;;  %s1902_s0 = inlined_call_operand.vmem [shape: f32[2,2,8,8], index: 0, kind: input, shape index: {}]   ;;  %s1903_s1 = inlined_call_operand.vmem [shape: f32[2,2,8,128], index: 1, kind: input, shape index: {}]   ;;  %s1904_s2 = inlined_call_operand.vmem [shape: f32[2,128,8], index: 2, kind: input, shape index: {}]   ;;  %s1905_s3 = inlined_call_operand.vmem [shape: bf16[2,128,8], index: 3, kind: input, shape index: {}]   ;;  %s1906_s4 = inlined_call_operand.vmem [shape: f32[2,1,8], index: 4, kind: input, shape index: {}]   ;;  %s1907_s5 = inlined_call_operand.vmem [shape: f32[16,128], index: 5, kind: input, shape index: {}]   ;;  %s1908_s6 = inlined_call_operand.vmem [shape: f32[1,128], index: 6, kind: input, shape index: {}]   ;;  %s1909_s7 = inlined_call_operand.hbm [shape: f32[2,8,128], index: 7, kind: output, shape index: {}]  }
   0x1   :  { %14 = vsyncpa [#allocation6 + $0x1], 0  ;;  %s1590_s24 = smov 0   ;;  %s1592_s25 = smov 0  }
   0x2   :  { %s1594_s26 = smov 0   ;;  %s1596_s27 = smov 0  }
   0x3   :  { %s1598_s28 = smov 0   ;;  %s1600_s29 = smov 0  }
   0x4 LB: > { %s1184_s30 = sadd.s32 4294967295, %s1541_s29   ;;  %s1185_s8 = sadd.s32 4294967294, %s1541_s29   ;;  %s1541_s29 = sphi %s1600_s29, %s20_s29   ;;  %s1537_s28 = sphi %s1598_s28, %s1916_s28   ;;  %s1533_s27 = sphi %s1596_s27, %s1915_s27   ;;  %s1529_s26 = sphi %s1594_s26, %s1914_s26   ;;  %s1525_s25 = sphi %s1592_s25, %s1913_s25   ;;  %s1521_s24 = sphi %s1590_s24, %s1912_s24  }
   0x5   : > { %s32_s9 = sadd.s32 1, %s1537_s28  ;;  %s217_s10 = sadd.s32 1, %s1529_s26 }
   0x6   : > { %p34_p0 = scmp.ge.s32.totalorder %s32_s9, 2  ;;  %p227_p1 = scmp.ne.s32.totalorder %s1529_s26, %s1525_s25 }
   0x7   : > { %p228_p2 = scmp.eq.s32.totalorder %s1184_s30, 1  ;;  %p233_p3 = scmp.ne.s32.totalorder %s1525_s25, %s1521_s24 }
   0x8   : > { %s1918_s9 = smov (%p34_p0, %s32_s9), 0  ;;  %p234_p5 = scmp.eq.s32.totalorder %s1185_s8, 1 }
   0x9   : > { %p1630_p4 = por %p228_p2, %p227_p1  ;;  %s214_s12 = ssub.s32 %s1537_s28, %s1918_s9 }
   0xa   : > { %p1188_p6 = scmp.ge.s32.totalorder %s1541_s29, 1  ;;  %p215_p7 = scmp.eq.s32.totalorder %s214_s12, 0 }
   0xb   : > { %p1637_p8 = por %p234_p5, %p233_p3  ;;  %p309_p9 = scmp.lt.s32.totalorder %s1541_s29, 3 }
   0xc   : > { %s1643_s14 = scalar_select %p215_p7, %s1529_s26, %s217_s10  }
   0xd   : > { %p310_p10 = pnand %p1188_p6, %p309_p9 }
   0xe   : > { %p370_p11 = scmp.lt.s32.totalorder (!%p310_p10), %s1533_s27, 1  ;;  %s1546_s12 = smov (!%p310_p10), 8  }
   0xf   : > { %313 = sbr.rel (%p310_p10) target bundleno = 1293 (0x50d), region = 48  ;;  %s1548_s20 = smov (!%p310_p10), 120  }
  0x14   : > { %v1543_v0 = vmov 0.0   ;;  %vm1544_vm0 = vmmov 0   ;;  %s1650_s15 = scalar_select %p370_p11, %s1533_s27, 1  ;;  %vm544_vm1 = vcmask 64512   ;;  %vm413_vm2 = vcmask 7168  }
  0x15   : > { %1293 = vmatprep.subr.mxu0 %v1543_v0  ;;  %1295 = vmatprep.mubr.msk.f32.mxu0 %vm1544_vm0, %v1543_v0  ;;  %v1545_v11 = vmov -inf   ;;  %v1547_v22 = vmov 0   ;;  %vm410_vm3 = vcmask 130048   ;;  %vm957_vm5 = vcmask 130112  }
  0x16   : > { %1298 = vmatprep.subr.mxu1 %v1543_v0  ;;  %1330 = vmatprep.mubr.msk.f32.mxu1 %vm1544_vm0, %v1543_v0  ;;  %s1209_s16 = sshll.u32 %s1650_s15, 4  ;;  %s1212_s23 = sshll.u32 %s1650_s15, 6  ;;  %414 = vst.msk [vmem:[#allocation3] sm:$0xff] %vm413_vm2, %v1545_v11  ;;  %415 = vst.msk [vmem:[#allocation3 + $0x8] sm:$0xff] %vm413_vm2, %v1545_v11 }
  0x17   : > { %s374_s19 = scalar_lea.vmem %s1902_s0, %s1209_s16  ;;  %s382_s22 = scalar_lea.vmem %s1903_s1, %s1209_s16  ;;  %1451 = vset.pattern.permute.xlu1 %v1547_v22  ;;  %1452 = vset.pattern.permute.xlu0 %v1547_v22  ;;  %411 = vst.msk [vmem:[#allocation2] sm:$0xff] %vm410_vm3, %v1543_v0  ;;  %412 = vst.msk [vmem:[#allocation2 + $0x8] sm:$0xff] %vm410_vm3, %v1543_v0 }
  0x18   : > { %v562_v1 = vld [vmem:[%s382_s22] sm:$0xff]  ;;  %v1200_v2 = vld [vmem:[%s382_s22 + $0x8] sm:$0xff]  ;;  %s1674_s10 = scalar_lea.vmem %s1905_s3, %s1212_s23  ;;  %s1211_s16 = sshll.u32 %s1650_s15, 7 }
  0x19   : > { %1294 = vmatpush3.msra.mxu0 %v562_v1  ;;  %v561_v3 = vld [vmem:[%s374_s19] sm:$0xff]  ;;  %v1199_v4 = vld [vmem:[%s374_s19 + $0x8] sm:$0xff]  ;;  %v1251_v5 = vld [vmem:[%s1674_s10 + $0x38] sm:$0xff]   ;;  %s1708_s19 = scalar_lea.vmem %s1904_s2, %s1211_s16  ;;  %s405_s23 = scalar_lea.vmem %s1906_s4, %s1650_s15 }
  0x1a   : > { %1296 = vmatmul.mubr.msk.f32.vlgmr.msra.gmra.mxu0 %vm544_vm1, %v561_v3  ;;  %1333 = vmatprep.subr.mxu0 %v1543_v0  ;;  %v1250_v6 = vld [vmem:[%s1674_s10 + $0x30] sm:$0xff]   ;;  %v1243_v7 = vunpack.c.l.bf16 %v1251_v5  ;;  %v1244_v8 = vunpack.c.h.bf16 %v1251_v5  ;;  %v1682_v14 = vld [vmem:[%s1674_s10 + $0x28] sm:$0xff]   ;;  %v1687_v16 = vld [vmem:[%s1674_s10 + $0x20] sm:$0xff]   ;;  %s1549_s15 = smov [#allocation5]  }
  0x1b   : > { %1334 = vmatpush3.msra.mxu0 %v1200_v2  ;;  %1335 = vmatprep.mubr.msk.f32.mxu0 %vm1544_vm0, %v1543_v0  ;;  %v1239_v9 = vunpack.c.l.bf16 %v1250_v6  ;;  %v1240_v10 = vunpack.c.h.bf16 %v1250_v6  ;;  %v1235_v15 = vunpack.c.l.bf16 %v1682_v14  ;;  %v1232_v17 = vunpack.c.h.bf16 %v1687_v16  ;;  %v462_v24 = vld [vmem:[%s1708_s19 + $0x70] sm:$0xff]  ;;  %v463_v26 = vld [vmem:[%s1708_s19 + $0x78] sm:$0xff]  ;;  %v461_v32 = vld [vmem:[%s1708_s19 + $0x68] sm:$0xff] }
  0x1c   : > { %1338 = vmatprep.subr.mxu0 %v1543_v0  ;;  %v1441_v12 = vpack.i.bf16 %v1243_v7, %v1244_v8  ;;  %v1236_v23 = vunpack.c.h.bf16 %v1682_v14  ;;  %v478_v27 = vmul.f32 %v1243_v7, %v462_v24  ;;  %v479_v29 = vmul.f32 %v1244_v8, %v463_v26  ;;  %v460_v33 = vld [vmem:[%s1708_s19 + $0x60] sm:$0xff]  ;;  %v1716_v34 = vld [vmem:[%s1674_s10 + $0x10] sm:$0xff]   ;;  %v1727_v44 = vld [vmem:[%s1674_s10 + $0x8] sm:$0xff]  }
  0x1d   : > { %v1446_v13 = vpack.i.bf16 %v1239_v9, %v1240_v10  ;;  %v477_v36 = vmul.f32 %v1240_v10, %v461_v32  ;;  %v476_v37 = vmul.f32 %v1239_v9, %v460_v33  ;;  %v1224_v38 = vunpack.c.h.bf16 %v1716_v34  ;;  %v1737_v46 = vld [vmem:[%s1674_s10] sm:$0xff]   ;;  %v459_v48 = vld [vmem:[%s1708_s19 + $0x58] sm:$0xff]  ;;  %v458_v49 = vld [vmem:[%s1708_s19 + $0x50] sm:$0xff] }
  0x1e   : > { %1336 = vmatmul.mubr.msk.f32.vlgmr.msra.gmra.mxu0 %vm544_vm1, %v1199_v4  ;;  %1442 = vrot.lane.b32.xlu1 %v1441_v12, %s1546_s12  ;;  %v1220_v45 = vunpack.c.h.bf16 %v1727_v44  ;;  %v1216_v47 = vunpack.c.h.bf16 %v1737_v46  ;;  %v636_v50 = vld [vmem:[#allocation3] sm:$0xff]  ;;  %v457_v52 = vld [vmem:[%s1708_s19 + $0x48] sm:$0xff]  ;;  %v475_v54 = vmul.f32 %v1236_v23, %v459_v48  ;;  %v474_v55 = vmul.f32 %v1235_v15, %v458_v49  ;;  %v1757_v59 = vld [vmem:[%s1674_s10 + $0x18] sm:$0xff]  }
  0x1f   : > { %1370 = vmatprep.mubr.msk.f32.mxu0 %vm1544_vm0, %v1543_v0  ;;  %v473_v57 = vmul.f32 %v1232_v17, %v457_v52  ;;  %v1231_v58 = vunpack.c.l.bf16 %v1687_v16  ;;  %v1228_v1 = vunpack.c.h.bf16 %v1757_v59  ;;  %v1227_v4 = vunpack.c.l.bf16 %v1757_v59  ;;  %v811_v10 = vld [vmem:[#allocation3 + $0x8] sm:$0xff]  ;;  %v456_v16 = vld [vmem:[%s1708_s19 + $0x40] sm:$0xff]  ;;  %v454_v26 = vld [vmem:[%s1708_s19 + $0x30] sm:$0xff] }
  0x20   : > { %v1223_v6 = vunpack.c.l.bf16 %v1716_v34  ;;  %v1219_v7 = vunpack.c.l.bf16 %v1727_v44  ;;  %v1215_v8 = vunpack.c.l.bf16 %v1737_v46 }
  0x22   : > { %1447 = vrot.lane.b32.xlu1 %v1446_v13, %s1546_s12 }
  0x26   : > { %516 = vrot.lane.b32.xlu1 %v1235_v15, %s1546_s12 }
  0x2a   : > { %514 = vrot.lane.b32.xlu1 %v1232_v17, %s1546_s12 }
  0x90   : > { %v1443_v25 = vpop.permute.xlu1 %1442 }
  0x91   : > { %v1444_v28 = vunpack.i.l.bf16 %v1443_v25  ;;  %v1445_v30 = vunpack.i.h.bf16 %v1443_v25 }
  0x93   : > { %v560_v31 = vsel %vm544_vm1, %v479_v29, %v1444_v28  ;;  %v559_v41 = vsel %vm544_vm1, %v478_v27, %v1445_v30  ;;  %v453_v27 = vld [vmem:[%s1708_s19 + $0x28] sm:$0xff]  ;;  %v470_v30 = vmul.f32 %v1227_v4, %v454_v26 }
  0x94   : > { %v1448_v35 = vpop.permute.xlu1 %1447  ;;  %1299 = vmatpush3.msra.mxu1 %v560_v31  ;;  %1339 = vmatpush3.msra.mxu0 %v560_v31  ;;  %v452_v31 = vld [vmem:[%s1708_s19 + $0x20] sm:$0xff]  ;;  %v469_v32 = vmul.f32 %v1224_v38, %v453_v27 }
  0x95   : > { %v1450_v39 = vunpack.i.h.bf16 %v1448_v35  ;;  %v1449_v40 = vunpack.i.l.bf16 %v1448_v35  ;;  %1300 = vmatprep.subr.mxu1 %v1543_v0  ;;  %1340 = vmatprep.subr.mxu0 %v1543_v0  ;;  %v451_v35 = vld [vmem:[%s1708_s19 + $0x18] sm:$0xff] }
  0x96   : > { %1301 = vmatpush3.msra.mxu1 %v559_v41  ;;  %1341 = vmatpush3.msra.mxu0 %v559_v41  ;;  %v467_v41 = vmul.f32 %v1220_v45, %v451_v35 }
  0x97   : > { %1302 = vmatprep.subr.mxu1 %v1543_v0  ;;  %1342 = vmatprep.subr.mxu0 %v1543_v0  ;;  %v558_v42 = vsel %vm544_vm1, %v477_v36, %v1449_v40  ;;  %v557_v43 = vsel %vm544_vm1, %v476_v37, %v1450_v39  ;;  %v468_v36 = vmul.f32 %v1223_v6, %v452_v31  ;;  %v450_v40 = vld [vmem:[%s1708_s19 + $0x10] sm:$0xff] }
  0x98   : > { %1303 = vmatpush3.msra.mxu1 %v558_v42  ;;  %1343 = vmatpush3.msra.mxu0 %v558_v42  ;;  %v517_v51 = vpop.permute.xlu1 %516  ;;  %v449_v42 = vld [vmem:[%s1708_s19 + $0x8] sm:$0xff] }
  0x99   : > { %1304 = vmatprep.subr.mxu1 %v1543_v0  ;;  %1344 = vmatprep.subr.mxu0 %v1543_v0  ;;  %v555_v63 = vsel %vm544_vm1, %v474_v55, %v517_v51  ;;  %v465_v44 = vmul.f32 %v1216_v47, %v449_v42 }
  0x9a   : > { %1305 = vmatpush3.msra.mxu1 %v557_v43  ;;  %1345 = vmatpush3.msra.mxu0 %v557_v43  ;;  %v466_v43 = vmul.f32 %v1219_v7, %v450_v40 }
  0x9b   : > { %1306 = vmatprep.subr.mxu1 %v1543_v0  ;;  %1346 = vmatprep.subr.mxu0 %v1543_v0 }
  0x9c   : > { %v515_v61 = vpop.permute.xlu1 %514 }
  0x9d   : > { %v554_v2 = vsel %vm544_vm1, %v473_v57, %v515_v61  ;;  %v651_v61 = vld [vmem:[#allocation2] sm:$0xff] }
  0xda   : > { %v1696_v18 = vpop.f32.mrf.mxu0 }
  0xdb   : > { %637 = vmax.xlane.f32.xlu0 %v1696_v18 }
  0xdc   : > { %v1297_v19 = vpop.f32.mrf.mxu0 }
  0xdd   : > { %v472_v19 = vmul.f32 %v1231_v58, %v456_v16 }
  0xde   : > { %v1699_v20 = vpop.f32.mrf.mxu0 }
  0xe0   : > { %v1337_v21 = vpop.f32.mrf.mxu0 }
  0xe1   : > { %v455_v21 = vld [vmem:[%s1708_s19 + $0x38] sm:$0xff] }
  0xf1   : > { %518 = vrot.lane.b32.xlu0 %v1236_v23, %s1546_s12  ;;  %v471_v23 = vmul.f32 %v1228_v1, %v455_v21 }
 0x110   : > { %812 = vmax.xlane.f32.xlu0 %v1699_v20 }
 0x126   : > { %506 = vrot.lane.b32.xlu0 %v1224_v38, %s1546_s12 }
 0x12a   : > { %502 = vrot.lane.b32.xlu0 %v1220_v45, %s1546_s12 }
 0x12e   : > { %498 = vrot.lane.b32.xlu0 %v1216_v47, %s1546_s12 }
 0x164   : > { %v638_v53 = vpop.xlane.xlu0 %637 }
 0x165   : > { %v639_v56 = vmax.f32 %v636_v50, %v638_v53 }
 0x167   : > { %732 = vst.msk [vmem:[#allocation3] sm:$0xff] %vm413_vm2, %v639_v56  ;;  %645 = vperm.xlu1 %1451, %v639_v56   ;;  %v640_v3 = vsub.f32 %v636_v50, %v639_v56  ;;  %v448_v50 = vld [vmem:[%s1708_s19] sm:$0xff]  ;;  %s1206_s19 = sshll.u32 %s1533_s27, 7  ;;  %s1469_s27 = sshll.u32 %s1549_s15, 4  ;;  %s1470_s27 = int_to_ptr.vmem [resolvable:$false] %s1469_s27 }
 0x168   : > { %v519_v60 = vpop.permute.xlu0 %518  ;;  %v464_v47 = vmul.f32 %v1215_v8, %v448_v50  ;;  %s1862_s30 = scalar_lea.hbm %s1909_s7, %s1206_s19 }
 0x169   : > { %v556_v62 = vsel %vm544_vm1, %v475_v54, %v519_v60  ;;  %v641_v5 = vmul.f32 1.442695, %v640_v3 }
 0x16a   : > { %1307 = vmatpush3.msra.mxu1 %v556_v62  ;;  %1347 = vmatpush3.msra.mxu0 %v556_v62 }
 0x16b   : > { %512 = vrot.lane.b32.xlu1 %v1231_v58, %s1546_s12  ;;  %1308 = vmatprep.subr.mxu1 %v1543_v0  ;;  %1453 = vpow2.f32 %v641_v5 }
 0x16c   : > { %1348 = vmatprep.subr.mxu0 %v1543_v0  ;;  %1309 = vmatpush3.msra.mxu1 %v555_v63 }
 0x16d   : > { %1349 = vmatpush3.msra.mxu0 %v555_v63  ;;  %1310 = vmatprep.subr.mxu1 %v1543_v0 }
 0x16e   : > { %1350 = vmatprep.subr.mxu0 %v1543_v0  ;;  %1311 = vmatpush3.msra.mxu1 %v554_v2 }
 0x16f   : > { %510 = vrot.lane.b32.xlu1 %v1228_v1, %s1546_s12  ;;  %1351 = vmatpush3.msra.mxu0 %v554_v2 }
 0x170   : > { %1312 = vmatprep.subr.mxu1 %v1543_v0  ;;  %1352 = vmatprep.subr.mxu0 %v1543_v0 }
 0x173   : > { %508 = vrot.lane.b32.xlu1 %v1227_v4, %s1546_s12 }
 0x177   : > { %504 = vrot.lane.b32.xlu1 %v1223_v6, %s1546_s12 }
 0x178   : > { %v1454_v9 = vpop.eup %1453 }
 0x17b   : > { %500 = vrot.lane.b32.xlu1 %v1219_v7, %s1546_s12 }
 0x17f   : > { %496 = vrot.lane.b32.xlu1 %v1215_v8, %s1546_s12 }
 0x183   : > { %654 = vperm.xlu1 %1451, %v1454_v9  }
 0x199   : > { %v813_v11 = vpop.xlane.xlu0 %812 }
 0x19a   : > { %v814_v12 = vmax.f32 %v811_v10, %v813_v11 }
 0x19c   : > { %v815_v13 = vsub.f32 %v811_v10, %v814_v12  ;;  %906 = vst.msk [vmem:[#allocation3 + $0x8] sm:$0xff] %vm413_vm2, %v814_v12  ;;  %820 = vperm.xlu0 %1452, %v814_v12  }
 0x19d   : > { %v507_v28 = vpop.permute.xlu0 %506 }
 0x19e   : > { %v816_v14 = vmul.f32 1.442695, %v815_v13  ;;  %v550_v38 = vsel %vm544_vm1, %v469_v32, %v507_v28 }
 0x1a0   : > { %1455 = vpow2.f32 %v816_v14 }
 0x1a1   : > { %v503_v39 = vpop.permute.xlu0 %502 }
 0x1a2   : > { %v548_v49 = vsel %vm544_vm1, %v467_v41, %v503_v39 }
 0x1a5   : > { %v499_v51 = vpop.permute.xlu0 %498 }
 0x1a6   : > { %v546_v54 = vsel %vm544_vm1, %v465_v44, %v499_v51 }
 0x1ad   : > { %v1456_v15 = vpop.eup %1455 }
 0x1ae   : > { %830 = vperm.xlu1 %1451, %v1456_v15   ;;  %v1202_v15 = vld [vmem:[%s405_s23] ss:$0 sm:$0xff] }
 0x1e2   : > { %v646_v17 = vpop.permute.xlu1 %645 }
 0x1e3   : > { %v648_v24 = vsub.f32 %v1696_v18, %v646_v17 }
 0x1e5   : > { %v649_v18 = vmul.f32 1.442695, %v648_v24 }
 0x1e6   : > { %v513_v22 = vpop.permute.xlu1 %512 }
 0x1e7   : > { %v553_v25 = vsel %vm544_vm1, %v472_v19, %v513_v22  ;;  %1457 = vpow2.f32 %v649_v18  ;;  %v911_v22 = vld [vmem:[%s1907_s5 + $0x8] sm:$0xff] }
 0x1e8   : > { %1313 = vmatpush3.msra.mxu1 %v553_v25  ;;  %1353 = vmatpush3.msra.mxu0 %v553_v25 }
 0x1e9   : > { %1314 = vmatprep.subr.mxu1 %v1543_v0  ;;  %1354 = vmatprep.subr.mxu0 %v1543_v0 }
 0x1ea   : > { %v511_v29 = vpop.permute.xlu1 %510 }
 0x1eb   : > { %v552_v33 = vsel %vm544_vm1, %v471_v23, %v511_v29  ;;  %v910_v23 = vld [vmem:[%s1907_s5] sm:$0xff] }
 0x1ec   : > { %1315 = vmatpush3.msra.mxu1 %v552_v33  ;;  %1355 = vmatpush3.msra.mxu0 %v552_v33 }
 0x1ed   : > { %1316 = vmatprep.subr.mxu1 %v1543_v0  ;;  %1356 = vmatprep.subr.mxu0 %v1543_v0 }
 0x1ee   : > { %v509_v37 = vpop.permute.xlu1 %508 }
 0x1ef   : > { %v551_v34 = vsel %vm544_vm1, %v470_v30, %v509_v37 }
 0x1f0   : > { %1317 = vmatpush3.msra.mxu1 %v551_v34  ;;  %1357 = vmatpush3.msra.mxu0 %v551_v34 }
 0x1f1   : > { %1318 = vmatprep.subr.mxu1 %v1543_v0  ;;  %1358 = vmatprep.subr.mxu0 %v1543_v0 }
 0x1f2   : > { %v505_v48 = vpop.permute.xlu1 %504  ;;  %1319 = vmatpush3.msra.mxu1 %v550_v38  ;;  %1359 = vmatpush3.msra.mxu0 %v550_v38 }
 0x1f3   : > { %1320 = vmatprep.subr.mxu1 %v1543_v0  ;;  %1360 = vmatprep.subr.mxu0 %v1543_v0  ;;  %v549_v45 = vsel %vm544_vm1, %v468_v36, %v505_v48 }
 0x1f4   : > { %1321 = vmatpush3.msra.mxu1 %v549_v45  ;;  %1361 = vmatpush3.msra.mxu0 %v549_v45  ;;  %v1458_v56 = vpop.eup %1457 }
 0x1f5   : > { %1322 = vmatprep.subr.mxu1 %v1543_v0  ;;  %1362 = vmatprep.subr.mxu0 %v1543_v0 }
 0x1f6   : > { %v501_v52 = vpop.permute.xlu1 %500  ;;  %1323 = vmatpush3.msra.mxu1 %v548_v49  ;;  %1363 = vmatpush3.msra.mxu0 %v548_v49 }
 0x1f7   : > { %1324 = vmatprep.subr.mxu1 %v1543_v0  ;;  %1364 = vmatprep.subr.mxu0 %v1543_v0  ;;  %v547_v53 = vsel %vm544_vm1, %v466_v43, %v501_v52 }
 0x1f8   : > { %1325 = vmatpush3.msra.mxu1 %v547_v53  ;;  %1365 = vmatpush3.msra.mxu0 %v547_v53 }
 0x1f9   : > { %1326 = vmatprep.subr.mxu1 %v1543_v0  ;;  %1366 = vmatprep.subr.mxu0 %v1543_v0 }
 0x1fa   : > { %v497_v55 = vpop.permute.xlu1 %496  ;;  %1327 = vmatpush3.msra.mxu1 %v546_v54  ;;  %1367 = vmatpush3.msra.mxu0 %v546_v54 }
 0x1fb   : > { %1328 = vmatprep.subr.mxu1 %v1543_v0  ;;  %1368 = vmatprep.subr.mxu0 %v1543_v0  ;;  %v545_v46 = vsel %vm544_vm1, %v464_v47, %v497_v55 }
 0x1fc   : > { %1329 = vmatpush3.msra.mxu1 %v545_v46  ;;  %1369 = vmatpush3.msra.mxu0 %v545_v46 }
 0x1fd   : > { %1331 = vmatmul.mubr.f32.vlgmr.msra.gmra.mxu1 %v1458_v56  ;;  %1373 = vmatprep.subr.mxu1 %v1543_v0 }
 0x1fe   : > { %1377 = vmatprep.mubr.msk.f32.mxu1 %vm1544_vm0, %v1543_v0  ;;  %v655_v62 = vpop.permute.xlu1 %654  ;;  %1374 = vmatpush3.msra.mxu1 %v911_v22 }
 0x1ff   : > { %v657_v63 = vmul.f32 %v655_v62, %v651_v61  ;;  %1375 = vmatprep.subr.mxu1 %v1543_v0  ;;  %v1203_v0 = vld [vmem:[%s1908_s6] ss:$0 sm:$0xff] }
 0x200   : > { %1376 = vmatpush3.msra.mxu1 %v910_v23 }
 0x217   : > { %v821_v57 = vpop.permute.xlu0 %820 }
 0x218   : > { %v823_v58 = vsub.f32 %v1699_v20, %v821_v57  ;;  %v827_v20 = vld [vmem:[#allocation2 + $0x8] sm:$0xff] }
 0x21a   : > { %v824_v59 = vmul.f32 1.442695, %v823_v58 }
 0x21c   : > { %1459 = vpow2.f32 %v824_v59 }
 0x229   : > { %v1460_v60 = vpop.eup %1459  ;;  %v831_v7 = vpop.permute.xlu1 %830 }
 0x22a   : > { %1371 = vmatmul.mubr.f32.vlgmr.msra.gmra.mxu0 %v1460_v60  ;;  %v833_v8 = vmul.f32 %v831_v7, %v827_v20 }
 0x2bd   : > { %v724_v1 = vpop.f32.mrf.mxu1 }
 0x2be   : > { %v728_v2 = vadd.f32 %v724_v1, %v657_v63 }
 0x2bf   : > { %v1332_v3 = vpop.f32.mrf.mxu1 }
 0x2c0   : > { %730 = vst.msk [vmem:[#allocation2] sm:$0xff] %vm410_vm3, %v728_v2 }
 0x2c7   : > { %v919_v4 = vld [vmem:[#allocation2] sm:$0xff] }
 0x2c8   : > { %v920_v5 = vmax.f32 %v919_v4, 1e-30  ;;  %vm923_vm4 = vcmp.gt.f32.partialorder %v919_v4, 0.0 }
 0x2ca   : > { %1461 = vrcp.f32 %v920_v5 }
 0x2d7   : > { %v1462_v6 = vpop.eup %1461 }
 0x2d8   : > { %925 = vrot.lane.b32.xlu0 %v1462_v6, %s1548_s20 }
 0x2ea   : > { %v900_v9 = vpop.f32.mrf.mxu0 }
 0x2eb   : > { %v904_v10 = vadd.f32 %v900_v9, %v833_v8 }
 0x2ec   : > { %v1372_v11 = vpop.f32.mrf.mxu0 }
 0x2ed   : > { %905 = vst.msk [vmem:[#allocation2 + $0x8] sm:$0xff] %vm410_vm3, %v904_v10 }
 0x2f4   : > { %v942_v12 = vld [vmem:[#allocation2 + $0x8] sm:$0xff] }
 0x2f5   : > { %v943_v13 = vmax.f32 %v942_v12, 1e-30  ;;  %vm946_vm6 = vcmp.gt.f32.partialorder %v942_v12, 0.0 }
 0x2f7   : > { %1463 = vrcp.f32 %v943_v13 }
 0x304   : > { %v1464_v14 = vpop.eup %1463 }
 0x305   : > { %948 = vrot.lane.b32.xlu1 %v1464_v14, %s1548_s20 }
 0x309   : > { %933 = vrot.lane.b32.xlu1 %v1202_v15, %s1546_s12 }
 0x34a   : > { %v926_v16 = vpop.permute.xlu0 %925 }
 0x34b   : > { %v928_v17 = vmul.f32 %v926_v16, %v919_v4 }
 0x34d   : > { %930 = vrot.lane.b32.xlu0 %v928_v17, %s1546_s12 }
 0x377   : > { %v949_v19 = vpop.permute.xlu1 %948 }
 0x378   : > { %v951_v21 = vmul.f32 %v949_v19, %v942_v12 }
 0x37a   : > { %953 = vrot.lane.b32.xlu1 %v951_v21, %s1546_s12  ;;  %s367_s12 = sand.u32 1, %s1525_s25  }
 0x37b   : > { %v934_v24 = vpop.permute.xlu1 %933  ;;  %s1189_s16 = sshll.u32 %s367_s12, 3  ;;  %s1041_s8 = scalar_lea.sflag [#allocation6], %s367_s12 }
 0x3bf   : > { %v931_v25 = vpop.permute.xlu0 %930 }
 0x3c0   : > { %v936_v26 = vsel %vm923_vm4, %v931_v25, %v934_v24 }
 0x3c1   : > { %938 = vrot.lane.b32.xlu0 %v936_v26, %s1548_s20  ;;  %s369_s20 = scalar_lea.vmem [#allocation5], %s1189_s16  ;;  %s1471_s16 = scalar_lea.vmem %s1470_s27, 256 }
 0x3c2   : > { %s1054_s21 = sshll.u32 %s369_s20, 4  ;;  %s1055_s21 = int_to_ptr.vmem [resolvable:$true] %s1054_s21 }
 0x3c3   : > { %s1465_s10 = scalar_lea.vmem %s1055_s21, 128  ;;  %p1472_p1 = scmp.lt.s32.totalorder %s1055_s21, %s1470_s27 }
 0x3c4   : > { %p1466_p12 = scmp.ne.s32.totalorder %s1055_s21, %s1465_s10  ;;  %p1473_p2 = scmp.lt.s32.totalorder %s1471_s16, %s1465_s10 }
 0x3c6   : > { %p1467_p13 = pnand %p1466_p12, %p1630_p4  ;;  %p1474_p3 = por %p1473_p2, %p1472_p1 }
 0x3c8   : > { %p1468_p0 = pneg %p1467_p13 }
 0x3ca   : > { %p1475_p5 = pnand %p1474_p3, %p1468_p0 }
 0x3ec   : > { %v954_v27 = vpop.permute.xlu1 %953 }
 0x3ed   : > { %v956_v29 = vsel %vm946_vm6, %v954_v27, %v934_v24 }
 0x433   : > { %v939_v28 = vpop.permute.xlu0 %938 }
 0x434   : > { %941 = vst.msk [vmem:[#allocation4] sm:$0xff] %vm544_vm1, %v939_v28 }
 0x435   : > { %958 = vst.msk [vmem:[#allocation4] sm:$0xff] %vm957_vm5, %v956_v29 }
 0x43c   : > { %v959_v30 = vld [vmem:[#allocation4] sm:$0xff] }
 0x43d   : > { %1378 = vmatmul.mubr.msk.f32.vlgmr.msra.gmra.mxu1 %vm410_vm3, %v959_v30 }
 0x4fd   : > { %v1035_v31 = vpop.f32.mrf.mxu1 }
 0x4fe   : > { %v1036_v32 = vadd.f32 %v1203_v0, %v1035_v31 }
 0x4ff   : > { %v1379_v18 = vpop.f32.mrf.mxu1 }
 0x500   : > { %1039 = vst [vmem:[%s369_s20] sm:$0xff] %v1036_v32 }
 0x501   : > { %1478 = shalt.err (!%p1475_p5)
}
 0x502   : > { %s1479_s17 = scalar_lea.hbm %s1862_s30, 128  ;;  %s1483_s19 = scalar_lea.hbm %s1909_s7, 256 }
 0x503   : > { %p1480_p6 = scmp.ne.s32.totalorder %s1862_s30, %s1479_s17  ;;  %p1484_p10 = scmp.lt.s32.totalorder %s1862_s30, %s1909_s7 }
 0x504   : > { %p1485_p11 = scmp.lt.s32.totalorder %s1483_s19, %s1479_s17 }
 0x505   : > { %p1481_p7 = pnand %p1480_p6, %p1630_p4 }
 0x506   : > { %p1486_p12 = por %p1485_p11, %p1484_p10 }
 0x507   : > { %p1482_p9 = pneg %p1481_p7 }
 0x509   : > { %p1487_p13 = pnand %p1486_p12, %p1482_p9 }
 0x50b   : > { %1490 = shalt.err (!%p1487_p13)
}
 0x50c   : > { %1380 = dma.vmem_to_hbm [thread:$0]  (%p1630_p4), %s1055_s21, 128, %s1862_s30, %s1041_s8  }
 0x50d PF: > { %p1386_p0 = scmp.ge.s32.totalorder %s1541_s29, 2  ;;  %s1066_s23 = sand.u32 1, %s1521_s24  }
 0x50e   : > { %s1067_s10 = scalar_lea.sflag [#allocation6], %s1066_s23 }
 0x50f   : > { %p1383_p1 = pnand %p1386_p0, %p1637_p8 }
 0x511   : > { %p1384_p2 = pneg %p1383_p1 }
 0x513   : > { %1516 = dma.done.wait (%p1384_p2), %s1067_s10, 128  }
 0x514   : > { %1518 = vsyncadd (%p1384_p2), %s1067_s10, 4294967168  ;;  %s20_s29 = sadd.s32 1, %s1541_s29   ;;  %s1912_s24 = smov %s1525_s25 }
 0x515   : > { %p17_p3 = scmp.ge.s32.totalorder %s20_s29, 4   ;;  %s1913_s25 = smov %s1529_s26 }
 0x516   : > { %s1914_s26 = smov %s1643_s14  ;;  %s1915_s27 = smov %s1537_s28 }
 0x517   : > { %s1916_s28 = smov %s1918_s9  ;;  %19 = sbr.rel (!%p17_p3) target bundleno = 4 (0x4), region = 107 }
 0x51c   :  { %1072 = vsyncpa [#allocation6], 1 }
 0x51d   :  { %1074 = vsyncpa [#allocation6 + $0x1], 1 }

</bundles_post_ra>
